<compile_context>
chip_gen: v6e
topology: v6e:2x2x1
jax: 0.10.0
libtpu: 0.0.40
codegen_flags: <defaults>
</compile_context>

<pallas_src>
import jax
import jax.numpy as jnp
from jax.experimental import pallas as pl
from jax.experimental.pallas import tpu as pltpu


# ----------------------------------------------------------------------------
# Pallas kernel: one batch element x one pixel tile, full channel dims.
#   g_ref  : (1, Cg, T)    s_ref : (1, Cs, T)
#   wgT_ref: (Co, Cg)      wsT_ref: (Co, Cs)      woT_ref: (Co, Co)
#   b1_ref : (Co, 1)   (= folded bg + bs)         bo_ref : (Co, 1)
#   o_ref  : (1, Co, T)
# ----------------------------------------------------------------------------
def attention_gate_kernel(g_ref, s_ref, wgT_ref, wsT_ref, woT_ref,
                          b1_ref, bo_ref, o_ref):
    z = (jnp.dot(wgT_ref[...], g_ref[0], preferred_element_type=jnp.float32)
         + jnp.dot(wsT_ref[...], s_ref[0], preferred_element_type=jnp.float32)
         + b1_ref[...])                                    # (Co, T) f32
    h = jnp.maximum(z, 0.0)                                # ReLU
    z2 = jnp.dot(woT_ref[...], h,
                 preferred_element_type=jnp.float32) + bo_ref[...]
    # Sigmoid via EUP exp + approximate EUP reciprocal (VALU stays free).
    sig = pl.reciprocal(1.0 + jnp.exp(-z2), approx=True)
    o_ref[0] = sig.astype(o_ref.dtype)


# ----------------------------------------------------------------------------
# Helpers
# ----------------------------------------------------------------------------
def _fold_bn(conv_w, conv_b, gamma, beta, mean, var, eps=1e-5):
    """Fold BatchNorm (running stats) into a 1x1 conv given as (Cin, Cout)."""
    conv_w = conv_w.astype(jnp.float32)
    conv_b = conv_b.astype(jnp.float32)
    scale = gamma.astype(jnp.float32) / jnp.sqrt(var.astype(jnp.float32) + eps)
    w = conv_w * scale[None, :]                            # (Cin, Cout)
    b = (conv_b - mean.astype(jnp.float32)) * scale + beta.astype(jnp.float32)
    return w, b


def _vmem_capacity_bytes():
    """Per-TensorCore VMEM capacity; conservative fallback if query fails."""
    try:
        return int(pltpu.get_tpu_info().vmem_capacity_bytes)
    except Exception:
        return 64 * 1024 * 1024        # v7x per-TC VMEM (smallest of the three)


def _pick_px_tile(hw, n_batch, per_px_bytes, fixed_bytes, vmem_capacity,
                  max_px_tile=32768):
    """Largest pixel tile (lanes) fitting a generation-aware VMEM budget."""
    if hw <= 128:
        # Full (last) array dim in one block: legal even if not 128-aligned.
        return hw
    budget = int(vmem_capacity * 0.75) - fixed_bytes - (2 << 20)
    t = min(max_px_tile, budget // max(per_px_bytes, 1))
    t = max(128, (t // 128) * 128)
    t = min(t, (hw // 128) * 128)      # never request a block larger than hw
    # v7x megacore: make sure there are >= 2 parallel grid blocks to shard
    # over the two TensorCores (neutral on 1-TC v5e/v6e).
    if n_batch * pl.cdiv(hw, t) < 2 and hw >= 256:
        t = min(t, max(128, pl.cdiv(pl.cdiv(hw, 2), 128) * 128))
        t = min(t, (hw // 128) * 128)
    return t


# ----------------------------------------------------------------------------
# Wrapper
# ----------------------------------------------------------------------------
def attention_gate_forward(g, s, params, *, out_dtype=None, max_px_tile=32768):
    """g: (N, Cg, H, W), s: (N, Cs, H, W)  (NCHW).  Returns (N, Co, H, W).

    For a bf16 I/O path (memory-bound op -> ~2x), pass g/s as bfloat16; the
    in-kernel accumulation stays f32 via preferred_element_type.
    """
    N, Cg, H, W = g.shape
    _, Cs, _, _ = s.shape
    Co = params["wo"].shape[1]
    HW = H * W
    out_dtype = g.dtype if out_dtype is None else out_dtype

    wg, bg = _fold_bn(params["wg"], params["bg"], params["gamma_g"],
                      params["beta_g"], params["mean_g"], params["var_g"])
    ws, bs = _fold_bn(params["ws"], params["bs"], params["gamma_s"],
                      params["beta_s"], params["mean_s"], params["var_s"])
    wo = params["wo"].astype(jnp.float32)
    bo = params["bo"].astype(jnp.float32)

    # Transposed weights for the channels-on-sublane layout (tiny, one-time).
    wgT = wg.T                                  # (Co, Cg)
    wsT = ws.T                                  # (Co, Cs)
    woT = wo.T                                  # (Co, Co)
    b1 = (bg + bs)[:, None]                     # (Co, 1) fused branch bias
    bo2 = bo[:, None]                           # (Co, 1)

    # NCHW -> (N, C, H*W): free reshape, no transpose, no pad.
    g2 = g.reshape(N, Cg, HW)
    s2 = s.reshape(N, Cs, HW)

    # VMEM-budget-aware pixel tile + explicit vmem limit.
    cap = _vmem_capacity_bytes()
    in_b = jnp.dtype(g.dtype).itemsize
    out_b = jnp.dtype(out_dtype).itemsize
    # double-buffered input + output blocks, plus f32 intermediates (z/h/z2/sig)
    per_px = 2 * (Cg + Cs) * in_b + 2 * Co * out_b + 4 * Co * 4
    fixed = 4 * (Co * (Cg + Cs + Co) + 2 * Co)           # resident weights/biases
    tile_px = _pick_px_tile(HW, N, per_px, fixed, cap, max_px_tile)
    n_px_tiles = pl.cdiv(HW, tile_px)
    grid = (N, n_px_tiles)

    need = per_px * tile_px + fixed + (4 << 20)
    vmem_limit = int(min(cap * 0.9, max(need, 32 << 20)))

    out = pl.pallas_call(
        attention_gate_kernel,
        out_shape=jax.ShapeDtypeStruct((N, Co, HW), out_dtype),
        grid_spec=pltpu.PrefetchScalarGridSpec(
            num_scalar_prefetch=0,
            grid=grid,
            in_specs=[
                pl.BlockSpec((1, Cg, tile_px), lambda n, p: (n, 0, p)),  # g
                pl.BlockSpec((1, Cs, tile_px), lambda n, p: (n, 0, p)),  # s
                pl.BlockSpec((Co, Cg), lambda n, p: (0, 0)),             # WgT
                pl.BlockSpec((Co, Cs), lambda n, p: (0, 0)),             # WsT
                pl.BlockSpec((Co, Co), lambda n, p: (0, 0)),             # WoT
                pl.BlockSpec((Co, 1), lambda n, p: (0, 0)),              # b1
                pl.BlockSpec((Co, 1), lambda n, p: (0, 0)),              # bo
            ],
            out_specs=pl.BlockSpec((1, Co, tile_px), lambda n, p: (n, 0, p)),
        ),
        compiler_params=pltpu.CompilerParams(
            dimension_semantics=("parallel", "parallel"),
            vmem_limit_bytes=vmem_limit),
    )(g2, s2, wgT, wsT, woT, b1, bo2)

    return out.reshape(N, Co, H, W)


# ----------------------------------------------------------------------------
# Pure-JAX reference (PyTorch module in eval() mode)
# ----------------------------------------------------------------------------
def attention_gate_reference(g, s, params, eps=1e-5):
    def conv1x1(x, w, b):  # x: NCHW, w: (Cin, Cout)
        return jnp.einsum("nchw,cd->ndhw", x, w) + b[None, :, None, None]

    def bn(x, gamma, beta, mean, var):
        inv = gamma / jnp.sqrt(var + eps)
        return (x - mean[None, :, None, None]) * inv[None, :, None, None] \
               + beta[None, :, None, None]

    Wg = bn(conv1x1(g, params["wg"], params["bg"]), params["gamma_g"],
            params["beta_g"], params["mean_g"], params["var_g"])
    Ws = bn(conv1x1(s, params["ws"], params["bs"]), params["gamma_s"],
            params["beta_s"], params["mean_s"], params["var_s"])
    h = jnp.maximum(Wg + Ws, 0.0)
    z = conv1x1(h, params["wo"], params["bo"])
    return jax.nn.sigmoid(z)


def make_params(key, in_c, out_c):
    """Deterministic synthetic parameters (shapes from the module __init__)."""
    ks = jax.random.split(key, 8)
    return {
        # Conv weights stored as (Cin, Cout) == transposed PyTorch (Cout,Cin,1,1)
        "wg": jax.random.normal(ks[0], (in_c[0], out_c), jnp.float32) * 0.2,
        "bg": jax.random.normal(ks[1], (out_c,), jnp.float32) * 0.1,
        "ws": jax.random.normal(ks[2], (in_c[1], out_c), jnp.float32) * 0.2,
        "bs": jax.random.normal(ks[3], (out_c,), jnp.float32) * 0.1,
        "wo": jax.random.normal(ks[4], (out_c, out_c), jnp.float32) * 0.2,
        "bo": jax.random.normal(ks[5], (out_c,), jnp.float32) * 0.1,
        # BatchNorm (running stats + affine) for each branch
        "gamma_g": jnp.ones((out_c,), jnp.float32),
        "beta_g": jnp.zeros((out_c,), jnp.float32),
        "mean_g": jax.random.normal(ks[6], (out_c,), jnp.float32) * 0.05,
        "var_g": jnp.ones((out_c,), jnp.float32) * 1.1,
        "gamma_s": jnp.ones((out_c,), jnp.float32) * 0.9,
        "beta_s": jnp.full((out_c,), 0.05, jnp.float32),
        "mean_s": jax.random.normal(ks[7], (out_c,), jnp.float32) * 0.05,
        "var_s": jnp.ones((out_c,), jnp.float32) * 0.9,
    }


if __name__ == "__main__":
    key = jax.random.PRNGKey(0)
    k_g, k_s, k_p, k_g2, k_s2 = jax.random.split(key, 5)

    in_c = (4, 8)     # channels of g and s
    out_c = 8
    params = make_params(k_p, in_c, out_c)

    # --- Test 1: small NCHW, f32, pixel count a multiple of 128 -------------
    N, H, W = 2, 16, 16
    g = jax.random.normal(k_g, (N, in_c[0], H, W), jnp.float32)
    s = jax.random.normal(k_s, (N, in_c[1], H, W), jnp.float32)
    out = jax.block_until_ready(attention_gate_forward(g, s, params))
    ref = attention_gate_reference(g, s, params)
    assert out.shape == (N, out_c, H, W)
    # approx EUP reciprocal in the sigmoid -> slightly loose tolerance
    assert jnp.allclose(out, ref, atol=5e-3, rtol=5e-3), "f32 mismatch"

    # --- Test 2: ragged pixel count (H*W % 128 != 0) -> partial last block --
    Nr, Hr, Wr = 1, 10, 13
    gr = jax.random.normal(k_g2, (Nr, in_c[0], Hr, Wr), jnp.float32)
    sr = jax.random.normal(k_s2, (Nr, in_c[1], Hr, Wr), jnp.float32)
    out_r = jax.block_until_ready(attention_gate_forward(gr, sr, params))
    ref_r = attention_gate_reference(gr, sr, params)
    assert out_r.shape == (Nr, out_c, Hr, Wr)
    assert jnp.allclose(out_r, ref_r, atol=5e-3, rtol=5e-3), "ragged mismatch"

    # --- Test 3: bf16 I/O path (f32 accumulation inside the kernel) ---------
    out_bf = jax.block_until_ready(
        attention_gate_forward(g.astype(jnp.bfloat16), s.astype(jnp.bfloat16),
                               params, out_dtype=jnp.bfloat16))
    assert out_bf.dtype == jnp.bfloat16
    assert jnp.allclose(out_bf.astype(jnp.float32), ref, atol=3e-2, rtol=3e-2), \
        "bf16 mismatch"

    print("KERNEL_OK")
</pallas_src>

<mosaic_0001>
module attributes {stable_mosaic.version = 11 : i64} {
  func.func @attention_gate_kernel(%arg0: i32, %arg1: i32, %arg2: memref<1x4x256xf32, #tpu.memory_space<vmem>>, %arg3: memref<1x8x256xf32, #tpu.memory_space<vmem>>, %arg4: memref<8x4xf32, #tpu.memory_space<vmem>>, %arg5: memref<8x8xf32, #tpu.memory_space<vmem>>, %arg6: memref<8x8xf32, #tpu.memory_space<vmem>>, %arg7: memref<8x1xf32, #tpu.memory_space<vmem>>, %arg8: memref<8x1xf32, #tpu.memory_space<vmem>>, %arg9: memref<1x8x256xf32, #tpu.memory_space<vmem>>) attributes {dimension_semantics = [#tpu.dimension_semantics<parallel>, #tpu.dimension_semantics<parallel>], iteration_bounds = array<i64: 2, 1>, scalar_prefetch = 0 : i64, scratch_operands = 0 : i64, tpu.core_type = #tpu.core_type<tc>, window_params = [{transform_indices = @transform_0, window_bounds = array<i64: 1, 4, 256>}, {transform_indices = @transform_1, window_bounds = array<i64: 1, 8, 256>}, {pipeline_mode = #tpu.pipeline_mode<synchronous>, transform_indices = @transform_2, window_bounds = array<i64: 8, 4>}, {pipeline_mode = #tpu.pipeline_mode<synchronous>, transform_indices = @transform_3, window_bounds = array<i64: 8, 8>}, {pipeline_mode = #tpu.pipeline_mode<synchronous>, transform_indices = @transform_4, window_bounds = array<i64: 8, 8>}, {pipeline_mode = #tpu.pipeline_mode<synchronous>, transform_indices = @transform_5, window_bounds = array<i64: 8, 1>}, {pipeline_mode = #tpu.pipeline_mode<synchronous>, transform_indices = @transform_6, window_bounds = array<i64: 8, 1>}, {transform_indices = @transform_7, window_bounds = array<i64: 1, 8, 256>}]} {
    %c0 = arith.constant 0 : index
    %c0_0 = arith.constant 0 : index
    %0 = vector.load %arg4[%c0, %c0_0] : memref<8x4xf32, #tpu.memory_space<vmem>>, vector<8x4xf32>
    %c0_1 = arith.constant 0 : index
    %c0_2 = arith.constant 0 : index
    %c0_3 = arith.constant 0 : index
    %1 = vector.load %arg2[%c0_1, %c0_2, %c0_3] : memref<1x4x256xf32, #tpu.memory_space<vmem>>, vector<1x4x256xf32>
    %2 = vector.shape_cast %1 : vector<1x4x256xf32> to vector<4x256xf32>
    %cst = arith.constant dense<0.000000e+00> : vector<8x256xf32>
    %3 = tpu.matmul %0, %2, %cst {dimension_numbers = #tpu.dot_dimension_numbers<[1], [0], [0], [1], [0, 0, 1, 1], [], []>} : vector<8x4xf32>, vector<4x256xf32>, vector<8x256xf32> -> vector<8x256xf32>
    %c0_4 = arith.constant 0 : index
    %c0_5 = arith.constant 0 : index
    %4 = vector.load %arg5[%c0_4, %c0_5] : memref<8x8xf32, #tpu.memory_space<vmem>>, vector<8x8xf32>
    %c0_6 = arith.constant 0 : index
    %c0_7 = arith.constant 0 : index
    %c0_8 = arith.constant 0 : index
    %5 = vector.load %arg3[%c0_6, %c0_7, %c0_8] : memref<1x8x256xf32, #tpu.memory_space<vmem>>, vector<1x8x256xf32>
    %6 = vector.shape_cast %5 : vector<1x8x256xf32> to vector<8x256xf32>
    %cst_9 = arith.constant dense<0.000000e+00> : vector<8x256xf32>
    %7 = tpu.matmul %4, %6, %cst_9 {dimension_numbers = #tpu.dot_dimension_numbers<[1], [0], [0], [1], [0, 0, 1, 1], [], []>} : vector<8x8xf32>, vector<8x256xf32>, vector<8x256xf32> -> vector<8x256xf32>
    %8 = arith.addf %3, %7 : vector<8x256xf32>
    %c0_10 = arith.constant 0 : index
    %c0_11 = arith.constant 0 : index
    %9 = vector.load %arg7[%c0_10, %c0_11] : memref<8x1xf32, #tpu.memory_space<vmem>>, vector<8x1xf32>
    %10 = vector.broadcast %9 : vector<8x1xf32> to vector<8x256xf32>
    %11 = arith.addf %8, %10 : vector<8x256xf32>
    %cst_12 = arith.constant 0.000000e+00 : f32
    %12 = vector.broadcast %cst_12 : f32 to vector<8x256xf32>
    %13 = arith.maximumf %11, %12 : vector<8x256xf32>
    %c0_13 = arith.constant 0 : index
    %c0_14 = arith.constant 0 : index
    %14 = vector.load %arg6[%c0_13, %c0_14] : memref<8x8xf32, #tpu.memory_space<vmem>>, vector<8x8xf32>
    %cst_15 = arith.constant dense<0.000000e+00> : vector<8x256xf32>
    %15 = tpu.matmul %14, %13, %cst_15 {dimension_numbers = #tpu.dot_dimension_numbers<[1], [0], [0], [1], [0, 0, 1, 1], [], []>} : vector<8x8xf32>, vector<8x256xf32>, vector<8x256xf32> -> vector<8x256xf32>
    %c0_16 = arith.constant 0 : index
    %c0_17 = arith.constant 0 : index
    %16 = vector.load %arg8[%c0_16, %c0_17] : memref<8x1xf32, #tpu.memory_space<vmem>>, vector<8x1xf32>
    %17 = vector.broadcast %16 : vector<8x1xf32> to vector<8x256xf32>
    %18 = arith.addf %15, %17 : vector<8x256xf32>
    %cst_18 = arith.constant 0.000000e+00 : f32
    %19 = vector.broadcast %cst_18 : f32 to vector<8x256xf32>
    %20 = arith.subf %19, %18 : vector<8x256xf32>
    %21 = math.exp %20 : vector<8x256xf32>
    %cst_19 = arith.constant 1.000000e+00 : f32
    %22 = vector.broadcast %cst_19 : f32 to vector<8x256xf32>
    %23 = arith.addf %22, %21 : vector<8x256xf32>
    %24 = tpu.reciprocal %23 {approx = true} : vector<8x256xf32> -> vector<8x256xf32>
    %c0_20 = arith.constant 0 : index
    %c0_21 = arith.constant 0 : index
    %c0_22 = arith.constant 0 : index
    %25 = vector.load %arg9[%c0_20, %c0_21, %c0_22] : memref<1x8x256xf32, #tpu.memory_space<vmem>>, vector<1x8x256xf32>
    %26 = vector.shape_cast %25 : vector<1x8x256xf32> to vector<8x256xf32>
    %27 = vector.shape_cast %24 : vector<8x256xf32> to vector<1x8x256xf32>
    tpu.vector_store %arg9[%c0_20, %c0_21, %c0_22], %27 {strides = array<i32>} : memref<1x8x256xf32, #tpu.memory_space<vmem>>, vector<1x8x256xf32>,
    return
  }
  func.func @transform_0(%arg0: i32, %arg1: i32) -> (i32, i32, i32) {
    %c0_i32 = arith.constant 0 : i32
    %c0_i32_0 = arith.constant 0 : i32
    return %arg0, %c0_i32, %arg1 : i32, i32, i32
  }
  func.func @transform_1(%arg0: i32, %arg1: i32) -> (i32, i32, i32) {
    %c0_i32 = arith.constant 0 : i32
    %c0_i32_0 = arith.constant 0 : i32
    return %arg0, %c0_i32, %arg1 : i32, i32, i32
  }
  func.func @transform_2(%arg0: i32, %arg1: i32) -> (i32, i32) {
    %c0_i32 = arith.constant 0 : i32
    %c0_i32_0 = arith.constant 0 : i32
    %c0_i32_1 = arith.constant 0 : i32
    return %c0_i32, %c0_i32_0 : i32, i32
  }
  func.func @transform_3(%arg0: i32, %arg1: i32) -> (i32, i32) {
    %c0_i32 = arith.constant 0 : i32
    %c0_i32_0 = arith.constant 0 : i32
    %c0_i32_1 = arith.constant 0 : i32
    return %c0_i32, %c0_i32_0 : i32, i32
  }
  func.func @transform_4(%arg0: i32, %arg1: i32) -> (i32, i32) {
    %c0_i32 = arith.constant 0 : i32
    %c0_i32_0 = arith.constant 0 : i32
    %c0_i32_1 = arith.constant 0 : i32
    return %c0_i32, %c0_i32_0 : i32, i32
  }
  func.func @transform_5(%arg0: i32, %arg1: i32) -> (i32, i32) {
    %c0_i32 = arith.constant 0 : i32
    %c0_i32_0 = arith.constant 0 : i32
    %c0_i32_1 = arith.constant 0 : i32
    return %c0_i32, %c0_i32_0 : i32, i32
  }
  func.func @transform_6(%arg0: i32, %arg1: i32) -> (i32, i32) {
    %c0_i32 = arith.constant 0 : i32
    %c0_i32_0 = arith.constant 0 : i32
    %c0_i32_1 = arith.constant 0 : i32
    return %c0_i32, %c0_i32_0 : i32, i32
  }
  func.func @transform_7(%arg0: i32, %arg1: i32) -> (i32, i32, i32) {
    %c0_i32 = arith.constant 0 : i32
    %c0_i32_0 = arith.constant 0 : i32
    return %arg0, %c0_i32, %arg1 : i32, i32, i32
  }
}

</mosaic_0001>

<bundles_post_ra>
// kernel: tpu_custom_call.1
= control target key start
LH: loop header
LB: loop body
LE: loop exit
PB: predicated region body
PF: predicated region fallthrough
CT: control target
= control target key end

     0   :  { %12 = vsyncpa [#allocation3], 0  ;;  %s1154_s0 = inlined_call_operand.vmem [shape: f32[2,4,256], index: 0, kind: input, shape index: {}]   ;;  %s1155_s1 = inlined_call_operand.hbm [shape: f32[2,8,256], index: 1, kind: input, shape index: {}]   ;;  %s1156_s2 = inlined_call_operand.vmem [shape: f32[8,4], index: 2, kind: input, shape index: {}]   ;;  %s1157_s3 = inlined_call_operand.vmem [shape: f32[8,8], index: 3, kind: input, shape index: {}]   ;;  %s1158_s4 = inlined_call_operand.vmem [shape: f32[8,8], index: 4, kind: input, shape index: {}]   ;;  %s1159_s5 = inlined_call_operand.vmem [shape: f32[8,1], index: 5, kind: input, shape index: {}]   ;;  %s1160_s6 = inlined_call_operand.vmem [shape: f32[8,1], index: 6, kind: input, shape index: {}]   ;;  %s1161_s7 = inlined_call_operand.hbm [shape: f32[2,8,256], index: 7, kind: output, shape index: {}]  }
   0x1   :  { %14 = vsyncpa [#allocation3 + $0x1], 0 }
   0x2   :  { %15 = vsyncpa [#allocation4], 0 }
   0x3   :  { %17 = vsyncpa [#allocation4 + $0x1], 0  ;;  %s988_s24 = smov 0   ;;  %s990_s25 = smov 0  }
   0x4   :  { %s992_s26 = smov 0   ;;  %s994_s27 = smov 0  }
   0x5   :  { %s996_s28 = smov 0   ;;  %s998_s29 = smov 0  }
   0x6 LB: > { %s735_s30 = sadd.s32 4294967295, %s942_s29   ;;  %s736_s8 = sadd.s32 4294967294, %s942_s29   ;;  %s942_s29 = sphi %s998_s29, %s23_s29   ;;  %s938_s28 = sphi %s996_s28, %s1173_s28   ;;  %s934_s27 = sphi %s994_s27, %s1172_s27   ;;  %s930_s26 = sphi %s992_s26, %s1171_s26   ;;  %s926_s25 = sphi %s990_s25, %s1170_s25   ;;  %s922_s24 = sphi %s988_s24, %s1169_s24  }
   0x7   : > { %s35_s9 = sadd.s32 1, %s938_s28  ;;  %s72_s10 = sadd.s32 1, %s930_s26 }
   0x8   : > { %p37_p0 = scmp.ge.s32.totalorder %s35_s9, 2  ;;  %p79_p1 = scmp.ne.s32.totalorder %s930_s26, %s926_s25 }
   0x9   : > { %p80_p2 = scmp.eq.s32.totalorder %s942_s29, 0  ;;  %p85_p3 = scmp.ne.s32.totalorder %s926_s25, %s922_s24 }
   0xa   : > { %s1175_s9 = smov (%p37_p0, %s35_s9), 0  ;;  %p86_p5 = scmp.eq.s32.totalorder %s735_s30, 0 }
   0xb   : > { %p1029_p4 = por %p80_p2, %p79_p1  ;;  %s67_s12 = ssub.s32 %s938_s28, %s1175_s9 }
   0xc   : > { %p216_p6 = scmp.eq.s32.totalorder %s735_s30, 1  ;;  %p70_p7 = scmp.eq.s32.totalorder %s67_s12, 0 }
   0xd   : > { %p1035_p8 = por %p86_p5, %p85_p3  ;;  %p222_p10 = scmp.eq.s32.totalorder %s736_s8, 1 }
   0xe   : > { %p1039_p9 = por %p216_p6, %p79_p1  ;;  %p772_p13 = scmp.lt.s32.totalorder %s942_s29, 2 }
   0xf   : > { %s1044_s15 = scalar_select %p70_p7, %s930_s26, %s72_s10  }
  0x10   : > { %p1046_p11 = por %p222_p10, %p85_p3  ;;  %s270_s17 = sand.u32 1, %s930_s26  }
  0x11   : > { %s739_s18 = sshll.u32 %s270_s17, 4  ;;  %s757_s19 = sshll.u32 %s938_s28, 8 }
  0x12   : > { %s1165_s16 = scalar_select %p1046_p11, 1, 0 }
  0x13   : > { %s282_s22 = scalar_lea.hbm %s1155_s1, %s757_s19  ;;  %s274_s23 = scalar_lea.vmem [#allocation2], %s739_s18 }
  0x14   : > { %s284_s30 = sshll.u32 %s274_s23, 4  ;;  %p1059_p0 = pnand %p772_p13, %p1029_p4  ;;  %s285_s30 = int_to_ptr.vmem [resolvable:$true] %s284_s30 }
  0x15   : > { %p742_p1 = scmp.ge.s32.totalorder %s942_s29, 1  ;;  %p289_p2 = scmp.lt.s32.totalorder %s942_s29, 3 }
  0x16   : > { %s271_s10 = scalar_lea.sflag [#allocation3], %s270_s17  ;;  %p836_p3 = pneg %p1059_p0 }
  0x17   : > { %s847_s12 = scalar_lea.vmem %s285_s30, 256  ;;  %s944_s20 = smov [#allocation2]  }
  0x18   : > { %p848_p5 = scmp.ne.s32.totalorder %s285_s30, %s847_s12  ;;  %s852_s19 = sshll.u32 %s944_s20, 4  ;;  %s853_s19 = int_to_ptr.vmem [resolvable:$false] %s852_s19 }
  0x19   : > { %s854_s18 = scalar_lea.vmem %s853_s19, 512  ;;  %p855_p10 = scmp.lt.s32.totalorder %s285_s30, %s853_s19 }
  0x1a   : > { %p850_p6 = pnand %p848_p5, %p836_p3  ;;  %p856_p12 = scmp.lt.s32.totalorder %s854_s18, %s847_s12 }
  0x1c   : > { %p851_p7 = pneg %p850_p6  ;;  %p857_p4 = por %p856_p12, %p855_p10 }
  0x1e   : > { %p858_p13 = pnand %p857_p4, %p851_p7 }
  0x20   : > { %861 = shalt.err (!%p858_p13)
}
  0x21   : > { %767 = dma.hbm_to_vmem [thread:$0]  (!%p1059_p0), %s282_s22, 256, %s285_s30, %s271_s10  }
  0x22   : > { %p290_p11 = pnand %p742_p1, %p289_p2 }
  0x23   : > { %s1074_s11 = sand.u32 (!%p290_p11), 1, %s926_s25  }
  0x24   : > { %293 = sbr.rel (%p290_p11) target bundleno = 500 (0x1f4), region = 48  ;;  %s743_s17 = sshll.u32 (!%p290_p11), %s1074_s11, 4 }
  0x25   : > { %s296_s21 = scalar_lea.sflag (!%p290_p11), [#allocation3], %s1074_s11  ;;  %s299_s23 = scalar_lea.vmem (!%p290_p11), [#allocation2], %s743_s17 }
  0x29   : > { %913 = dma.done.wait (%p1035_p8), %s296_s21, 256  }
  0x2a   : > { %915 = vsyncadd (%p1035_p8), %s296_s21, 4294967040  ;;  %p340_p12 = scmp.lt.s32.totalorder %s934_s27, 1  ;;  %v945_v0 = vmov 0.0   ;;  %v946_v1 = vmov 0   ;;  %v355_v2 = vld [vmem:[%s299_s23 + $0x8] sm:$0xff]  ;;  %v354_v3 = vld [vmem:[%s299_s23] sm:$0xff] }
  0x2b   : > { %424 = vmatprep.mubr.f32.mxu0 %v945_v0  ;;  %506 = vmatprep.mubr.f32.mxu1 %v945_v0  ;;  %v353_v4 = vld [vmem:[%s1157_s3] sm:$0xff]  ;;  %vm356_vm0 = vcmask 64512   ;;  %vm437_vm1 = vcmask 1043456   ;;  %vm433_vm2 = vcmask 31744   ;;  %s338_s20 = scalar_lea.vmem [#allocation5], %s743_s17 }
  0x2c   : > { %s341_s22 = scalar_select %p340_p12, %s934_s27, 1  ;;  %824 = vset.pattern.permute.xlu0 %v946_v1  ;;  %390 = vmatprep.subr.mxu0 %v355_v2  ;;  %v513_v6 = vld [vmem:[%s1159_s5] sm:$0xff] }
  0x2d   : > { %391 = vmatpush1.msra.mxu0 %v354_v3  ;;  %516 = vperm.xlu0 %824, %v513_v6   ;;  %v351_v8 = vld [vmem:[%s1156_s2] sm:$0xff]  ;;  %s633_s19 = sshll.u32 %s338_s20, 4  ;;  %s634_s19 = int_to_ptr.vmem [resolvable:$true] %s633_s19 }
  0x2e   : > { %s758_s30 = sshll.u32 %s341_s22, 3  ;;  %747 = vmatmul.mubr.msk.f32.vlgmr.msra.gmra.mxu0 %vm356_vm0, %v353_v4  ;;  %v524_v9 = vld [vmem:[%s1160_s6] sm:$0xff]  ;;  %s617_s22 = scalar_lea.sflag [#allocation4], %s1074_s11 }
  0x2f   : > { %s347_s12 = scalar_lea.vmem %s1154_s0, %s758_s30  ;;  %597 = vmatprep.mubr.f32.mxu0 %v945_v0  ;;  %v523_v21 = vld [vmem:[%s1158_s4] sm:$0xff]  ;;  %s862_s23 = scalar_lea.vmem %s634_s19, 256 }
  0x30   : > { %v352_v5 = vld [vmem:[%s347_s12] sm:$0xff]  ;;  %s759_s12 = sshll.u32 %s934_s27, 8  ;;  %p863_p8 = scmp.ne.s32.totalorder %s634_s19, %s862_s23 }
  0x31   : > { %v432_v7 = vcombine.high %v352_v5, %v352_v5  ;;  %527 = vperm.xlu0 %824, %v524_v9   ;;  %s1112_s21 = scalar_lea.hbm %s1161_s7, %s759_s12  ;;  %s947_s27 = smov [#allocation5]  }
  0x32   : > { %p864_p11 = pnand %p863_p8, %p1039_p9  ;;  %s866_s30 = sshll.u32 %s947_s27, 4  ;;  %s867_s30 = int_to_ptr.vmem [resolvable:$false] %s866_s30 }
  0x33   : > { %748 = vmatprep.subr.msk.mxu1 %vm437_vm1, %v432_v7  ;;  %s868_s17 = scalar_lea.vmem %s867_s30, 512  ;;  %p869_p1 = scmp.lt.s32.totalorder %s634_s19, %s867_s30 }
  0x34   : > { %749 = vmatpush1.msk.msra.mxu1 %vm437_vm1, %v352_v5  ;;  %p865_p0 = pneg %p864_p11  ;;  %p870_p2 = scmp.lt.s32.totalorder %s868_s17, %s862_s23 }
  0x35   : > { %750 = vmatmul.mubr.msk.f32.vlgmr.msra.gmra.mxu1 %vm433_vm2, %v351_v8 }
  0x36   : > { %p871_p3 = por %p870_p2, %p869_p1 }
  0x38   : > { %p872_p5 = pnand %p871_p3, %p865_p0 }
  0xa8   : > { %v517_v15 = vpop.permute.xlu0 %516 }
  0xac   : > { %v528_v22 = vpop.permute.xlu0 %527 }
  0xee   : > { %v426_v10 = vpop.f32.mrf.mxu0 }
  0xf0   : > { %v428_v13 = vpop.f32.mrf.mxu0 }
  0xf5   : > { %v508_v11 = vpop.f32.mrf.mxu1 }
  0xf6   : > { %v509_v12 = vadd.f32 %v508_v11, %v426_v10 }
  0xf7   : > { %v510_v14 = vpop.f32.mrf.mxu1 }
  0xf8   : > { %v511_v16 = vadd.f32 %v510_v14, %v428_v13  ;;  %v519_v17 = vadd.f32 %v517_v15, %v509_v12 }
  0xfa   : > { %v520_v18 = vadd.f32 %v517_v15, %v511_v16  ;;  %v521_v20 = vmax.f32 %v519_v17, 0.0 }
  0xfc   : > { %v522_v19 = vmax.f32 %v520_v18, 0.0 }
  0xfe   : > { %563 = vmatprep.subr.mxu0 %v522_v19 }
  0xff   : > { %564 = vmatpush1.msra.mxu0 %v521_v20 }
 0x100   : > { %751 = vmatmul.mubr.msk.f32.vlgmr.msra.gmra.mxu0 %vm356_vm0, %v523_v21 }
 0x1c0   : > { %v599_v23 = vpop.f32.mrf.mxu0 }
 0x1c1   : > { %v600_v24 = vadd.f32 %v599_v23, %v528_v22 }
 0x1c2   : > { %v601_v25 = vpop.f32.mrf.mxu0 }
 0x1c3   : > { %v604_v26 = vsub.f32 0.0, %v600_v24  ;;  %v602_v27 = vadd.f32 %v601_v25, %v528_v22 }
 0x1c5   : > { %v606_v28 = vmul.f32 1.442695, %v604_v26  ;;  %v605_v29 = vsub.f32 0.0, %v602_v27 }
 0x1c7   : > { %826 = vpow2.f32 %v606_v28  ;;  %v608_v30 = vmul.f32 1.442695, %v605_v29 }
 0x1c9   : > { %828 = vpow2.f32 %v608_v30 }
 0x1d4   : > { %v827_v31 = vpop.eup %826 }
 0x1d5   : > { %v610_v32 = vadd.f32 1.0, %v827_v31 }
 0x1d6   : > { %v829_v33 = vpop.eup %828 }
 0x1d7   : > { %830 = vrcp.f32 %v610_v32  ;;  %v611_v34 = vadd.f32 1.0, %v829_v33 }
 0x1d9   : > { %832 = vrcp.f32 %v611_v34 }
 0x1e4   : > { %v831_v35 = vpop.eup %830 }
 0x1e5   : > { %614 = vst [vmem:[%s338_s20] sm:$0xff] %v831_v35 }
 0x1e6   : > { %v833_v36 = vpop.eup %832 }
 0x1e7   : > { %615 = vst [vmem:[%s338_s20 + $0x8] sm:$0xff] %v833_v36 }
 0x1e8   : > { %875 = shalt.err (!%p872_p5)
}
 0x1e9   : > { %s876_s8 = scalar_lea.hbm %s1112_s21, 256  ;;  %s880_s12 = scalar_lea.hbm %s1161_s7, 512 }
 0x1ea   : > { %p877_p6 = scmp.ne.s32.totalorder %s1112_s21, %s876_s8  ;;  %p881_p4 = scmp.lt.s32.totalorder %s1112_s21, %s1161_s7 }
 0x1eb   : > { %p882_p13 = scmp.lt.s32.totalorder %s880_s12, %s876_s8 }
 0x1ec   : > { %p878_p7 = pnand %p877_p6, %p1039_p9 }
 0x1ed   : > { %p883_p12 = por %p882_p13, %p881_p4 }
 0x1ee   : > { %p879_p10 = pneg %p878_p7 }
 0x1f0   : > { %p884_p8 = pnand %p883_p12, %p879_p10 }
 0x1f2   : > { %887 = shalt.err (!%p884_p8)
}
 0x1f3   : > { %762 = dma.vmem_to_hbm [thread:$0]  (%p1039_p9), %s634_s19, 256, %s1112_s21, %s617_s22  }
 0x1f4 PF: > { %s645_s18 = sand.u32 1, %s922_s24   ;;  %p1167_p11 = scmp.ne.s32.totalorder %s1165_s16, 0 }
 0x1f5   : > { %p1168_p0 = scmp.ge.s32.totalorder %s942_s29, 2  ;;  %s646_s23 = scalar_lea.sflag [#allocation4], %s645_s18 }
 0x1f7   : > { %p769_p1 = pnand %p1168_p0, %p1167_p11 }
 0x1f9   : > { %p770_p2 = pneg %p769_p1 }
 0x1fb   : > { %917 = dma.done.wait (%p770_p2), %s646_s23, 256  }
 0x1fc   : > { %919 = vsyncadd (%p770_p2), %s646_s23, 4294967040  ;;  %s23_s29 = sadd.s32 1, %s942_s29   ;;  %s1169_s24 = smov %s926_s25 }
 0x1fd   : > { %p20_p3 = scmp.ge.s32.totalorder %s23_s29, 4   ;;  %s1170_s25 = smov %s930_s26 }
 0x1fe   : > { %s1171_s26 = smov %s1044_s15  ;;  %s1172_s27 = smov %s938_s28 }
 0x1ff   : > { %s1173_s28 = smov %s1175_s9  ;;  %22 = sbr.rel (!%p20_p3) target bundleno = 6 (0x6), region = 96 }
 0x204   :  { %651 = vsyncpa [#allocation3], 1 }
 0x205   :  { %653 = vsyncpa [#allocation3 + $0x1], 1 }
 0x206   :  { %654 = vsyncpa [#allocation4], 1 }
 0x207   :  { %656 = vsyncpa [#allocation4 + $0x1], 1 }

</bundles_post_ra>
